<compile_context>
chip_gen: v5e
topology: v5e:2x2
jax: 0.10.0
libtpu: 0.0.40
codegen_flags: <defaults>
</compile_context>

<pallas_src>
import functools

import jax
import jax.numpy as jnp
from jax.experimental import pallas as pl
from jax.experimental.pallas import tpu as pltpu


def _round_up(x, m):
    return ((x + m - 1) // m) * m


def _oim_ce_kernel(x_ref, lut_ref, tgt_ref, logits_ref, nll_ref,
                   m_sc, l_sc, t_sc, *, scalar, num_classes, c_tile):
    """One (batch_tile, class_tile) grid step.

    x_ref:      (B_TILE, F)       matmul dtype (f32 or bf16)
    lut_ref:    (F, C_TILE)       matmul dtype (pre-transposed LUT)
    tgt_ref:    (B_TILE, 1)       int32
    logits_ref: (B_TILE, C_TILE)  f32 output tile (lane-dense)
    nll_ref:    (B_TILE, 1)       f32 per-example NLL (written at last class tile)
    m_sc/l_sc/t_sc: (B_TILE, 1)   f32 scratch: running max / sum-exp / target logit
    """
    k = pl.program_id(1)

    @pl.when(k == 0)
    def _init():
        m_sc[...] = jnp.full(m_sc.shape, -jnp.inf, dtype=m_sc.dtype)
        l_sc[...] = jnp.zeros(l_sc.shape, dtype=l_sc.dtype)
        t_sc[...] = jnp.zeros(t_sc.shape, dtype=t_sc.dtype)

    x = x_ref[...]
    if scalar != 1.0:
        # (s*x) @ lut.T == s * (x @ lut.T); scaling x is O(B*F) instead of O(B*C).
        x = x * jnp.asarray(scalar, dtype=x.dtype)

    # (B_TILE, F) @ (F, C_TILE) -> f32 accumulate on the MXU.
    logits = jnp.dot(x, lut_ref[...], preferred_element_type=jnp.float32)
    logits_ref[...] = logits

    # Global class ids for this tile; mask padded classes out of the softmax.
    cls = k * c_tile + jax.lax.broadcasted_iota(jnp.int32, logits.shape, 1)
    masked = jnp.where(cls < num_classes, logits, -jnp.inf)

    # Online softmax statistics (running max m, running sum-of-exp l).
    m_prev = m_sc[...]
    m_new = jnp.maximum(m_prev, jnp.max(masked, axis=-1, keepdims=True))
    alpha = jnp.exp(m_prev - m_new)
    p = jnp.exp(masked - m_new)
    l_sc[...] = alpha * l_sc[...] + jnp.sum(p, axis=-1, keepdims=True)
    m_sc[...] = m_new

    # Target-class logit: the target falls in exactly one class tile.
    tgt = tgt_ref[...]  # (B_TILE, 1) int32
    t_sc[...] = t_sc[...] + jnp.sum(
        jnp.where(cls == tgt, logits, 0.0), axis=-1, keepdims=True)

    @pl.when(k == pl.num_programs(1) - 1)
    def _finalize():
        lse = m_sc[...] + jnp.log(l_sc[...])
        nll_ref[...] = lse - t_sc[...]


def oim_loss_forward(inputs, lut, targets, scalar=1.0, *,
                     matmul_dtype=jnp.bfloat16, b_tile=None, c_tile=None):
    """Returns (loss, scaled_logits) like OIMLoss.forward (forward pass only).

    inputs:  (B, F) float
    lut:     (C, F) float
    targets: (B,)   int
    """
    B, F = inputs.shape
    C, F2 = lut.shape
    assert F == F2, "feature dims of inputs and lut must match"

    # Tile sizes: batch tile multiple of 16 (covers bf16 sublane packing), class
    # tile multiple of 128 (lane-dense output stores, MXU-friendly).
    if b_tile is None:
        b_tile = min(256, _round_up(max(B, 1), 16))
    if c_tile is None:
        c_tile = min(512, _round_up(max(C, 1), 128))
    b_tile = _round_up(b_tile, 16)
    c_tile = _round_up(c_tile, 128)

    b_pad = _round_up(B, b_tile)
    c_pad = _round_up(C, c_tile)

    x = inputs.astype(matmul_dtype)
    lut_t = lut.T.astype(matmul_dtype)                 # (F, C): contraction on sublane axis
    tgt = targets.astype(jnp.int32).reshape(B, 1)

    if b_pad != B:
        x = jnp.pad(x, ((0, b_pad - B), (0, 0)))
        tgt = jnp.pad(tgt, ((0, b_pad - B), (0, 0)))
    if c_pad != C:
        lut_t = jnp.pad(lut_t, ((0, 0), (0, c_pad - C)))

    grid = (b_pad // b_tile, c_pad // c_tile)

    kernel = functools.partial(_oim_ce_kernel, scalar=float(scalar),
                               num_classes=C, c_tile=c_tile)

    # VMEM budget: every input/output block is double-buffered by BlockSpec.
    in_bytes = jnp.dtype(matmul_dtype).itemsize
    block_bytes = (b_tile * F * in_bytes        # x tile
                   + F * c_tile * in_bytes      # lut tile
                   + b_tile * 4                 # targets tile
                   + b_tile * c_tile * 4        # logits tile
                   + b_tile * 4)                # nll tile
    est = 2 * block_bytes + 3 * b_tile * 4
    vmem_limit = int(min(max(4 * est, 16 << 20), 48 << 20))

    logits_pad, nll_pad = pl.pallas_call(
        kernel,
        grid=grid,
        in_specs=[
            pl.BlockSpec((b_tile, F), lambda i, k: (i, 0)),      # x: reused across k
            pl.BlockSpec((F, c_tile), lambda i, k: (0, k)),      # lut_t: reused across i
            pl.BlockSpec((b_tile, 1), lambda i, k: (i, 0)),      # targets
        ],
        out_specs=(
            pl.BlockSpec((b_tile, c_tile), lambda i, k: (i, k)),  # lane-dense logits tile
            pl.BlockSpec((b_tile, 1), lambda i, k: (i, 0)),       # per-example NLL (finalize)
        ),
        out_shape=(
            jax.ShapeDtypeStruct((b_pad, c_pad), jnp.float32),
            jax.ShapeDtypeStruct((b_pad, 1), jnp.float32),
        ),
        scratch_shapes=[
            pltpu.VMEM((b_tile, 1), jnp.float32),   # running max
            pltpu.VMEM((b_tile, 1), jnp.float32),   # running sum of exp
            pltpu.VMEM((b_tile, 1), jnp.float32),   # target logit
        ],
        compiler_params=pltpu.CompilerParams(
            dimension_semantics=("parallel", "arbitrary"),
            vmem_limit_bytes=vmem_limit,
        ),
    )(x, lut_t, tgt)

    logits = logits_pad[:B, :C]
    # weight=None, size_average=True -> mean over the true batch (padded rows dropped).
    loss = jnp.sum(nll_pad[:B, 0]) / B
    return loss, logits


def _reference(inputs, lut, targets, scalar=1.0, matmul_dtype=jnp.float32):
    """Pure-JAX reference of the PyTorch forward, mirroring the kernel's matmul dtype."""
    x = inputs.astype(matmul_dtype)
    if scalar != 1.0:
        x = x * jnp.asarray(scalar, matmul_dtype)
    prec = (jax.lax.Precision.HIGHEST
            if jnp.dtype(matmul_dtype) == jnp.dtype(jnp.float32) else None)
    logits = jnp.dot(x, lut.T.astype(matmul_dtype),
                     preferred_element_type=jnp.float32, precision=prec)
    logp = jax.nn.log_softmax(logits, axis=-1)
    nll = -jnp.take_along_axis(logp, targets[:, None].astype(jnp.int32), axis=-1)
    return jnp.mean(nll), logits


if __name__ == "__main__":
    key = jax.random.PRNGKey(0)
    k_x, k_lut, k_t = jax.random.split(key, 3)

    num_features = 64
    num_classes = 300     # padded to 384 (c_tile=128): exercises class-tile masking
    batch = 20            # padded to 32 (b_tile=16): exercises padded-row exclusion
    scalar = 10.0

    inputs = jax.random.normal(k_x, (batch, num_features), dtype=jnp.float32)
    # Deterministic non-degenerate LUT: unit-norm rows (module init is zeros).
    lut = jax.random.normal(k_lut, (num_classes, num_features), dtype=jnp.float32)
    lut = lut / jnp.linalg.norm(lut, axis=-1, keepdims=True)
    targets = jax.random.randint(k_t, (batch,), 0, num_classes, dtype=jnp.int32)

    # --- float32 matmul path (v5e-friendly) ---------------------------------
    loss32, logits32 = oim_loss_forward(
        inputs, lut, targets, scalar=scalar,
        matmul_dtype=jnp.float32, b_tile=16, c_tile=128)
    jax.block_until_ready((loss32, logits32))
    ref_loss32, ref_logits32 = _reference(inputs, lut, targets, scalar, jnp.float32)
    assert logits32.shape == (batch, num_classes)
    # Tolerance absorbs the matmul-precision mode of the f32 MXU path.
    assert jnp.allclose(logits32, ref_logits32, atol=0.5, rtol=1e-3), "f32 logits mismatch"
    assert jnp.allclose(loss32, ref_loss32, atol=0.5, rtol=1e-3), "f32 loss mismatch"

    # --- bf16 matmul path (v6e/v7x MXU, f32 accumulate) ---------------------
    loss16, logits16 = oim_loss_forward(
        inputs, lut, targets, scalar=scalar,
        matmul_dtype=jnp.bfloat16, b_tile=16, c_tile=128)
    jax.block_until_ready((loss16, logits16))
    ref_loss16, ref_logits16 = _reference(inputs, lut, targets, scalar, jnp.bfloat16)
    assert jnp.allclose(logits16, ref_logits16, atol=1e-2, rtol=1e-3), "bf16 logits mismatch"
    assert jnp.allclose(loss16, ref_loss16, atol=1e-2, rtol=1e-3), "bf16 loss mismatch"
    # Sanity: bf16 path stays close to the f32 truth.
    assert jnp.allclose(loss16, ref_loss32, atol=1.0, rtol=5e-2), "bf16 loss far from f32"

    print("KERNEL_OK")
</pallas_src>

<mosaic_0001>
module attributes {stable_mosaic.version = 11 : i64} {
  func.func @_oim_ce_kernel(%arg0: i32, %arg1: i32, %arg2: memref<16x64xf32, #tpu.memory_space<vmem>>, %arg3: memref<64x128xf32, #tpu.memory_space<vmem>>, %arg4: memref<16x1xi32, #tpu.memory_space<vmem>>, %arg5: memref<16x128xf32, #tpu.memory_space<vmem>>, %arg6: memref<16x1xf32, #tpu.memory_space<vmem>>, %arg7: memref<16x1xf32, #tpu.memory_space<vmem>>, %arg8: memref<16x1xf32, #tpu.memory_space<vmem>>, %arg9: memref<16x1xf32, #tpu.memory_space<vmem>>) attributes {dimension_semantics = [#tpu.dimension_semantics<parallel>, #tpu.dimension_semantics<arbitrary>], iteration_bounds = array<i64: 2, 3>, scalar_prefetch = 0 : i64, scratch_operands = 3 : i64, tpu.core_type = #tpu.core_type<tc>, window_params = [{transform_indices = @transform_0, window_bounds = array<i64: 16, 64>}, {transform_indices = @transform_1, window_bounds = array<i64: 64, 128>}, {transform_indices = @transform_2, window_bounds = array<i64: 16, 1>}, {transform_indices = @transform_3, window_bounds = array<i64: 16, 128>}, {transform_indices = @transform_4, window_bounds = array<i64: 16, 1>}]} {
    %c0_i32 = arith.constant 0 : i32
    %0 = arith.cmpi eq, %arg1, %c0_i32 : i32
    %1 = arith.extui %0 : i1 to i32
    %c0_i32_0 = arith.constant 0 : i32
    %2 = arith.cmpi ne, %1, %c0_i32_0 : i32
    scf.if %2 {
      %cst_27 = arith.constant 0xFF800000 : f32
      %46 = vector.broadcast %cst_27 : f32 to vector<16x1xf32>
      %c0_28 = arith.constant 0 : index
      %c0_29 = arith.constant 0 : index
      %47 = vector.load %arg7[%c0_28, %c0_29] : memref<16x1xf32, #tpu.memory_space<vmem>>, vector<16x1xf32>
      tpu.vector_store %arg7[%c0_28, %c0_29], %46 {strides = array<i32>} : memref<16x1xf32, #tpu.memory_space<vmem>>, vector<16x1xf32>,
      %cst_30 = arith.constant 0.000000e+00 : f32
      %48 = vector.broadcast %cst_30 : f32 to vector<16x1xf32>
      %c0_31 = arith.constant 0 : index
      %c0_32 = arith.constant 0 : index
      %49 = vector.load %arg8[%c0_31, %c0_32] : memref<16x1xf32, #tpu.memory_space<vmem>>, vector<16x1xf32>
      tpu.vector_store %arg8[%c0_31, %c0_32], %48 {strides = array<i32>} : memref<16x1xf32, #tpu.memory_space<vmem>>, vector<16x1xf32>,
      %cst_33 = arith.constant 0.000000e+00 : f32
      %50 = vector.broadcast %cst_33 : f32 to vector<16x1xf32>
      %c0_34 = arith.constant 0 : index
      %c0_35 = arith.constant 0 : index
      %51 = vector.load %arg9[%c0_34, %c0_35] : memref<16x1xf32, #tpu.memory_space<vmem>>, vector<16x1xf32>
      tpu.vector_store %arg9[%c0_34, %c0_35], %50 {strides = array<i32>} : memref<16x1xf32, #tpu.memory_space<vmem>>, vector<16x1xf32>,
    } else {
    }
    %c0 = arith.constant 0 : index
    %c0_1 = arith.constant 0 : index
    %3 = vector.load %arg2[%c0, %c0_1] : memref<16x64xf32, #tpu.memory_space<vmem>>, vector<16x64xf32>
    %cst = arith.constant 1.000000e+01 : f32
    %4 = vector.broadcast %cst : f32 to vector<16x64xf32>
    %5 = arith.mulf %3, %4 : vector<16x64xf32>
    %c0_2 = arith.constant 0 : index
    %c0_3 = arith.constant 0 : index
    %6 = vector.load %arg3[%c0_2, %c0_3] : memref<64x128xf32, #tpu.memory_space<vmem>>, vector<64x128xf32>
    %cst_4 = arith.constant dense<0.000000e+00> : vector<16x128xf32>
    %7 = tpu.matmul %5, %6, %cst_4 {dimension_numbers = #tpu.dot_dimension_numbers<[1], [0], [0], [1], [0, 0, 1, 1], [], []>} : vector<16x64xf32>, vector<64x128xf32>, vector<16x128xf32> -> vector<16x128xf32>
    %c0_5 = arith.constant 0 : index
    %c0_6 = arith.constant 0 : index
    %8 = vector.load %arg5[%c0_5, %c0_6] : memref<16x128xf32, #tpu.memory_space<vmem>>, vector<16x128xf32>
    tpu.vector_store %arg5[%c0_5, %c0_6], %7 {strides = array<i32>} : memref<16x128xf32, #tpu.memory_space<vmem>>, vector<16x128xf32>,
    %c128_i32 = arith.constant 128 : i32
    %9 = arith.muli %arg1, %c128_i32 : i32
    %10 = tpu.iota {dimensions = array<i32: 1>} : vector<16x128xi32>
    %11 = vector.broadcast %9 : i32 to vector<16x128xi32>
    %12 = arith.addi %11, %10 : vector<16x128xi32>
    %c300_i32 = arith.constant 300 : i32
    %13 = vector.broadcast %c300_i32 : i32 to vector<16x128xi32>
    %14 = arith.cmpi slt, %12, %13 : vector<16x128xi32>
    %cst_7 = arith.constant 0xFF800000 : f32
    %15 = vector.broadcast %cst_7 : f32 to vector<16x128xf32>
    %16 = arith.select %14, %7, %15 : vector<16x128xi1>, vector<16x128xf32>
    %c0_8 = arith.constant 0 : index
    %c0_9 = arith.constant 0 : index
    %17 = vector.load %arg7[%c0_8, %c0_9] : memref<16x1xf32, #tpu.memory_space<vmem>>, vector<16x1xf32>
    %cst_10 = arith.constant dense<0xFF800000> : vector<16xf32>
    %18 = vector.multi_reduction <maximumf>, %16, %cst_10 [1] : vector<16x128xf32> to vector<16xf32>
    %19 = vector.shape_cast %18 : vector<16xf32> to vector<16x1xf32>
    %20 = arith.maximumf %17, %19 : vector<16x1xf32>
    %21 = arith.subf %17, %20 : vector<16x1xf32>
    %22 = math.exp %21 : vector<16x1xf32>
    %23 = vector.broadcast %20 : vector<16x1xf32> to vector<16x128xf32>
    %24 = arith.subf %16, %23 : vector<16x128xf32>
    %25 = math.exp %24 : vector<16x128xf32>
    %c0_11 = arith.constant 0 : index
    %c0_12 = arith.constant 0 : index
    %26 = vector.load %arg8[%c0_11, %c0_12] : memref<16x1xf32, #tpu.memory_space<vmem>>, vector<16x1xf32>
    %27 = arith.mulf %22, %26 : vector<16x1xf32>
    %cst_13 = arith.constant dense<0.000000e+00> : vector<16xf32>
    %28 = vector.multi_reduction <add>, %25, %cst_13 [1] : vector<16x128xf32> to vector<16xf32>
    %29 = vector.shape_cast %28 : vector<16xf32> to vector<16x1xf32>
    %30 = arith.addf %27, %29 : vector<16x1xf32>
    %c0_14 = arith.constant 0 : index
    %c0_15 = arith.constant 0 : index
    %31 = vector.load %arg8[%c0_14, %c0_15] : memref<16x1xf32, #tpu.memory_space<vmem>>, vector<16x1xf32>
    tpu.vector_store %arg8[%c0_14, %c0_15], %30 {strides = array<i32>} : memref<16x1xf32, #tpu.memory_space<vmem>>, vector<16x1xf32>,
    %c0_16 = arith.constant 0 : index
    %c0_17 = arith.constant 0 : index
    %32 = vector.load %arg7[%c0_16, %c0_17] : memref<16x1xf32, #tpu.memory_space<vmem>>, vector<16x1xf32>
    tpu.vector_store %arg7[%c0_16, %c0_17], %20 {strides = array<i32>} : memref<16x1xf32, #tpu.memory_space<vmem>>, vector<16x1xf32>,
    %c0_18 = arith.constant 0 : index
    %c0_19 = arith.constant 0 : index
    %33 = vector.load %arg4[%c0_18, %c0_19] : memref<16x1xi32, #tpu.memory_space<vmem>>, vector<16x1xi32>
    %c0_20 = arith.constant 0 : index
    %c0_21 = arith.constant 0 : index
    %34 = vector.load %arg9[%c0_20, %c0_21] : memref<16x1xf32, #tpu.memory_space<vmem>>, vector<16x1xf32>
    %35 = vector.broadcast %33 : vector<16x1xi32> to vector<16x128xi32>
    %36 = arith.cmpi eq, %12, %35 : vector<16x128xi32>
    %cst_22 = arith.constant 0.000000e+00 : f32
    %37 = vector.broadcast %cst_22 : f32 to vector<16x128xf32>
    %38 = arith.select %36, %7, %37 : vector<16x128xi1>, vector<16x128xf32>
    %cst_23 = arith.constant dense<0.000000e+00> : vector<16xf32>
    %39 = vector.multi_reduction <add>, %38, %cst_23 [1] : vector<16x128xf32> to vector<16xf32>
    %40 = vector.shape_cast %39 : vector<16xf32> to vector<16x1xf32>
    %41 = arith.addf %34, %40 : vector<16x1xf32>
    %c0_24 = arith.constant 0 : index
    %c0_25 = arith.constant 0 : index
    %42 = vector.load %arg9[%c0_24, %c0_25] : memref<16x1xf32, #tpu.memory_space<vmem>>, vector<16x1xf32>
    tpu.vector_store %arg9[%c0_24, %c0_25], %41 {strides = array<i32>} : memref<16x1xf32, #tpu.memory_space<vmem>>, vector<16x1xf32>,
    %c2_i32 = arith.constant 2 : i32
    %43 = arith.cmpi eq, %arg1, %c2_i32 : i32
    %44 = arith.extui %43 : i1 to i32
    %c0_i32_26 = arith.constant 0 : i32
    %45 = arith.cmpi ne, %44, %c0_i32_26 : i32
    scf.if %45 {
      %c0_27 = arith.constant 0 : index
      %c0_28 = arith.constant 0 : index
      %46 = vector.load %arg7[%c0_27, %c0_28] : memref<16x1xf32, #tpu.memory_space<vmem>>, vector<16x1xf32>
      %c0_29 = arith.constant 0 : index
      %c0_30 = arith.constant 0 : index
      %47 = vector.load %arg8[%c0_29, %c0_30] : memref<16x1xf32, #tpu.memory_space<vmem>>, vector<16x1xf32>
      %48 = math.log %47 : vector<16x1xf32>
      %49 = arith.addf %46, %48 : vector<16x1xf32>
      %c0_31 = arith.constant 0 : index
      %c0_32 = arith.constant 0 : index
      %50 = vector.load %arg9[%c0_31, %c0_32] : memref<16x1xf32, #tpu.memory_space<vmem>>, vector<16x1xf32>
      %51 = arith.subf %49, %50 : vector<16x1xf32>
      %c0_33 = arith.constant 0 : index
      %c0_34 = arith.constant 0 : index
      %52 = vector.load %arg6[%c0_33, %c0_34] : memref<16x1xf32, #tpu.memory_space<vmem>>, vector<16x1xf32>
      tpu.vector_store %arg6[%c0_33, %c0_34], %51 {strides = array<i32>} : memref<16x1xf32, #tpu.memory_space<vmem>>, vector<16x1xf32>,
    } else {
    }
    return
  }
  func.func @transform_0(%arg0: i32, %arg1: i32) -> (i32, i32) {
    %c0_i32 = arith.constant 0 : i32
    %c0_i32_0 = arith.constant 0 : i32
    return %arg0, %c0_i32 : i32, i32
  }
  func.func @transform_1(%arg0: i32, %arg1: i32) -> (i32, i32) {
    %c0_i32 = arith.constant 0 : i32
    %c0_i32_0 = arith.constant 0 : i32
    return %c0_i32, %arg1 : i32, i32
  }
  func.func @transform_2(%arg0: i32, %arg1: i32) -> (i32, i32) {
    %c0_i32 = arith.constant 0 : i32
    %c0_i32_0 = arith.constant 0 : i32
    return %arg0, %c0_i32 : i32, i32
  }
  func.func @transform_3(%arg0: i32, %arg1: i32) -> (i32, i32) {
    %c0_i32 = arith.constant 0 : i32
    return %arg0, %arg1 : i32, i32
  }
  func.func @transform_4(%arg0: i32, %arg1: i32) -> (i32, i32) {
    %c0_i32 = arith.constant 0 : i32
    %c0_i32_0 = arith.constant 0 : i32
    return %arg0, %c0_i32 : i32, i32
  }
}

</mosaic_0001>

<bundles_post_ra>
// kernel: tpu_custom_call.1
= control target key start
LH: loop header
LB: loop body
LE: loop exit
PB: predicated region body
PF: predicated region fallthrough
CT: control target
= control target key end

     0   :  { %10 = vsyncpa [#allocation6], 0  ;;  %s1169_s0 = inlined_call_operand.vmem [shape: f32[32,64], index: 0, kind: input, shape index: {}]   ;;  %s1170_s1 = inlined_call_operand.hbm [shape: f32[64,384], index: 1, kind: input, shape index: {}]   ;;  %s1171_s2 = inlined_call_operand.vmem [shape: s32[32,1], index: 2, kind: input, shape index: {}]   ;;  %s1172_s3 = inlined_call_operand.hbm [shape: f32[32,384], index: 3, kind: output, shape index: {0}]   ;;  %s1173_s4 = inlined_call_operand.vmem [shape: f32[32,1], index: 4, kind: output, shape index: {1}]  }
   0x1   :  { %12 = vsyncpa [#allocation6 + $0x1], 0 }
   0x2   :  { %13 = vsyncpa [#allocation7], 0 }
   0x3   :  { %15 = vsyncpa [#allocation7 + $0x1], 0  ;;  %s951_s15 = smov 0   ;;  %s953_s16 = smov 0  }
   0x4   :  { %s955_s17 = smov 0   ;;  %s957_s18 = smov 0  }
   0x5   :  { %s959_s19 = smov 0   ;;  %s961_s20 = smov 0  }
   0x6   :  { %s963_s21 = smov 0   ;;  %s965_s22 = smov 0  }
   0x7   :  { %s967_s23 = smov 0   ;;  %s969_s24 = smov 0  }
   0x8   :  { %s971_s25 = smov 0  }
   0x9 LB: > { %1177 = sst [smem:[#allocation11_spill]] %s911_s24  ;;  %s602_s26 = sadd.s32 4294967295, %s915_s25   ;;  %s915_s25 = sphi %s971_s25, %s21_s25   ;;  %s911_s24 = sphi %s969_s24, %s1190_s24   ;;  %s907_s23 = sphi %s967_s23, %s1198_s23   ;;  %s903_s22 = sphi %s965_s22, %s1188_s22   ;;  %s899_s21 = sphi %s963_s21, %s1197_s21   ;;  %s895_s20 = sphi %s961_s20, %s1196_s20   ;;  %s891_s19 = sphi %s959_s19, %s1195_s19   ;;  %s887_s18 = sphi %s957_s18, %s1194_s18   ;;  %s883_s17 = sphi %s955_s17, %s1193_s17   ;;  %s879_s16 = sphi %s953_s16, %s1192_s16   ;;  %s875_s15 = sphi %s951_s15, %s1191_s15  }
   0xa   : > { %s603_s27 = sadd.s32 4294967294, %s915_s25   ;;  %s30_s28 = sadd.s32 1, %s907_s23 }
   0xb   : > { %s33_s29 = sadd.s32 1, %s911_s24  ;;  %p31_p0 = scmp.ge.s32.totalorder %s30_s28, 3 }
   0xc   : > { %s66_s30 = sadd.s32 1, %s895_s20  ;;  %p73_p1 = scmp.ne.s32.totalorder %s895_s20, %s891_s19 }
   0xd   : > { %p74_p2 = scmp.eq.s32.totalorder %s915_s25, 0  ;;  %s1200_s28 = smov (%p31_p0, %s30_s28), 0 }
   0xe   : > { %1178 = sst [smem:[#allocation12_spill]] %s1200_s28  ;;  %s1202_s29 = smov (!%p31_p0, %s33_s29), %s911_s24 }
   0xf   : > { %s63_s5 = ssub.s32 %s907_s23, %s1200_s28  ;;  %p1017_p3 = por %p74_p2, %p73_p1 }
  0x10   : > { %p35_p4 = scmp.ge.s32.totalorder %s1202_s29, 2  ;;  %p64_p5 = scmp.eq.s32.totalorder %s63_s5, 0 }
  0x11   : > { %p79_p6 = scmp.ne.s32.totalorder %s891_s19, %s887_s18  ;;  %p80_p7 = scmp.eq.s32.totalorder %s602_s26, 0 }
  0x12   : > { %s1204_s29 = smov (%p35_p4, %s1202_s29), 0  ;;  %s120_s11 = sadd.s32 1, %s883_s17 }
  0x13   : > { %1180 = sst [smem:[#allocation13_spill]] %s1204_s29  ;;  %p1027_p8 = por %p80_p7, %p79_p6 }
  0x14   : > { %s1025_s7 = scalar_select %p64_p5, %s895_s20, %s66_s30  }
  0x15   : > { %s115_s9 = ssub.s32 %s911_s24, %s1204_s29  ;;  %p130_p10 = scmp.ne.s32.totalorder %s883_s17, %s879_s16 }
  0x16   : > { %1181 = sst [smem:[#allocation14_spill]] %s1025_s7  ;;  %s117_s10 = sor.u32 %s115_s9, %s63_s5 }
  0x17   : > { %p118_p9 = scmp.eq.s32.totalorder %s117_s10, 0  ;;  %p131_p11 = scmp.eq.s32.totalorder %s602_s26, 5 }
  0x18   : > { %p136_p12 = scmp.ne.s32.totalorder %s879_s16, %s875_s15  ;;  %p137_p0 = scmp.eq.s32.totalorder %s603_s27, 5 }
  0x19   : > { %s1039_s12 = scalar_select %p118_p9, %s883_s17, %s120_s11  }
  0x1a   : > { %p1041_p13 = por %p131_p11, %p130_p10  ;;  %p649_p1 = scmp.lt.s32.totalorder %s915_s25, 6 }
  0x1b   : > { %1183 = sst [smem:[#allocation15_spill]] %s1039_s12  ;;  %p1046_p2 = por %p137_p0, %p136_p12 }
  0x1c   : > { %s192_s18 = sand.u32 1, %s895_s20   ;;  %s607_s5 = sshll.u32 %s907_s23, 3 }
  0x1d   : > { %s606_s30 = sshll.u32 %s192_s18, 6  ;;  %s200_s10 = scalar_lea.hbm %s1170_s1, %s607_s5 }
  0x1e   : > { %s196_s11 = scalar_lea.vmem [#allocation5], %s606_s30  ;;  %s201_s28 = sshll.u32 %s200_s10, 4  ;;  %s202_s28 = int_to_ptr.hbm [resolvable:$true] %s201_s28 }
  0x1f   : > { %s203_s29 = sshll.u32 %s196_s11, 4  ;;  %p642_p4 = pnand %p649_p1, %p1017_p3  ;;  %s204_s29 = int_to_ptr.vmem [resolvable:$true] %s203_s29 }
  0x20   : > { %s193_s27 = scalar_lea.sflag [#allocation6], %s192_s18  ;;  %s917_s24 = smov 384  }
  0x21   : > { %s918_s7 = smov 128   ;;  %s919_s12 = smov 8  }
  0x22   : > { %644 = dma.hbm_to_vmem [thread:$0]  (!%p642_p4), %s202_s28, 1024, %s204_s29, %s193_s27, %s917_s24, %s918_s7, %s919_s12  }
  0x23   : > { %p608_p5 = scmp.ge.s32.totalorder %s915_s25, 1  ;;  %p220_p6 = scmp.lt.s32.totalorder %s915_s25, 7 }
  0x25   : > { %p221_p7 = pnand %p608_p5, %p220_p6 }
  0x26   : > { %s226_s26 = sand.u32 (!%p221_p7), 1, %s891_s19  }
  0x27   : > { %224 = sbr.rel (%p221_p7) target bundleno = 616 (0x268), region = 32  ;;  %s609_s5 = sshll.u32 (!%p221_p7), %s226_s26, 6 }
  0x28   : > { %s227_s30 = scalar_lea.sflag (!%p221_p7), [#allocation6], %s226_s26  ;;  %s1060_s9 = scalar_lea.vmem (!%p221_p7), [#allocation5], %s609_s5 }
  0x2c   : > { %866 = dma.done.wait (%p1027_p8), %s227_s30, 1024  }
  0x2d   : > { %868 = vsyncadd (%p1027_p8), %s227_s30, 4294966272  ;;  %s261_s24 = sand.u32 1, %s879_s16   ;;  %s611_s28 = sshll.u32 %s903_s22, 1 }
  0x2e   : > { %s610_s29 = sshll.u32 %s261_s24, 4  ;;  %p272_p3 = scmp.lt.s32.totalorder %s611_s28, 3 }
  0x2f   : > { %s1085_s30 = scalar_lea.vmem [#allocation8], %s610_s29  ;;  %p617_p8 = scmp.ne.s32.totalorder %s899_s21, 0 }
  0x30   : > { %s1206_s28 = smov (!%p272_p3, %s611_s28), 3 }
  0x31   : > { %s612_s6 = sshll.u32 %s1206_s28, 3  ;;  %293 = sbr.rel (%p617_p8) target bundleno = 61 (0x3d), region = 40 }
  0x32   : > { %s1073_s18 = scalar_lea.vmem %s1169_s0, %s612_s6  ;;  %s1078_s8 = scalar_lea.vmem %s1171_s2, %s612_s6 }
  0x33   : > { %s1083_s5 = scalar_lea.vmem %s1173_s4, %s612_s6 }
  0x36   : > { %vm294_vm0 = vcmask 7168   ;;  %v920_v0 = vmov -inf   ;;  %v921_v1 = vmov 0.0  }
  0x37   : > { %295 = vst.msk [vmem:[#allocation2] sm:$0xff] %vm294_vm0, %v920_v0 }
  0x38   : > { %296 = vst.msk [vmem:[#allocation2 + $0x8] sm:$0xff] %vm294_vm0, %v920_v0 }
  0x39   : > { %297 = vst.msk [vmem:[#allocation3] sm:$0xff] %vm294_vm0, %v921_v1 }
  0x3a   : > { %298 = vst.msk [vmem:[#allocation3 + $0x8] sm:$0xff] %vm294_vm0, %v921_v1 }
  0x3b   : > { %299 = vst.msk [vmem:[#allocation4] sm:$0xff] %vm294_vm0, %v921_v1 }
  0x3c   : > { %300 = vst.msk [vmem:[#allocation4 + $0x8] sm:$0xff] %vm294_vm0, %v921_v1 }
  0x3d PF: > { %v312_v2 = vld [vmem:[%s1060_s9 + $0x38] sm:$0xff]  ;;  %v311_v3 = vld [vmem:[%s1060_s9 + $0x30] sm:$0xff]  ;;  %v310_v4 = vld [vmem:[%s1060_s9 + $0x28] sm:$0xff]  ;;  %v922_v5 = vmov 0   ;;  %vm313_vm1 = vcmask 523264   ;;  %v346_v18 = vlaneseq  ;;  %s620_s28 = sshll.u32 %s899_s21, 7 }
  0x3e   : > { %328 = vmatpush.msra.mxu0 %v312_v2  ;;  %628 = vmatpush.msra.mxu1 %v312_v2  ;;  %v398_v6 = vld [vmem:[%s1078_s8] sm:$0xff]  ;;  %v309_v7 = vld [vmem:[%s1060_s9 + $0x20] sm:$0xff]  ;;  %v308_v8 = vld [vmem:[%s1060_s9 + $0x18] sm:$0xff]  ;;  %v348_v20 = vstv %s620_s28  ;;  %vm393_vm5 = vcmask 7168   ;;  %p621_p9 = scmp.ne.s32.totalorder %s899_s21, 2 }
  0x3f   : > { %749 = vset.pattern.permute.xlu2 %v922_v5  ;;  %748 = vset.pattern.permute.xlu1 %v922_v5  ;;  %v307_v9 = vld [vmem:[%s1060_s9 + $0x10] sm:$0xff]  ;;  %v302_v11 = vld [vmem:[%s1073_s18 + $0x8] sm:$0xff]  ;;  %v306_v13 = vld [vmem:[%s1060_s9 + $0x8] sm:$0xff]  ;;  %v347_v19 = vand.u32 127, %v346_v18 }
  0x40   : > { %329 = vmatpush.msra.mxu0 %v311_v3  ;;  %629 = vmatpush.msra.mxu1 %v311_v3  ;;  %v301_v10 = vld [vmem:[%s1073_s18] sm:$0xff]  ;;  %v399_v12 = vld [vmem:[%s1078_s8 + $0x8] sm:$0xff]  ;;  %v305_v14 = vld [vmem:[%s1060_s9] sm:$0xff]  ;;  %v304_v16 = vmul.f32 10.0, %v302_v11 }
  0x41   : > { %403 = vperm.xlu2 %749, %v398_v6   ;;  %750 = vset.pattern.permute.xlu0 %v922_v5  ;;  %v303_v15 = vmul.f32 10.0, %v301_v10  ;;  %v349_v21 = vadd.s32 %v348_v20, %v347_v19  ;;  %v353_v30 = vld [vmem:[#allocation2] sm:$0xff]  ;;  %v354_v36 = vld [vmem:[#allocation2 + $0x8] sm:$0xff]  ;;  %v383_v51 = vld [vmem:[#allocation3] sm:$0xff] }
  0x42   : > { %330 = vmatpush.msra.mxu0 %v310_v4  ;;  %630 = vmatpush.msra.mxu1 %v310_v4  ;;  %v400_v29 = vld [vmem:[#allocation4] sm:$0xff]  ;;  %v384_v56 = vld [vmem:[#allocation3 + $0x8] sm:$0xff] }
  0x43   : > { %vm350_vm3 = vcmp.lt.s32.totalorder %v349_v21, 300  ;;  %v401_v57 = vld [vmem:[#allocation4 + $0x8] sm:$0xff] }
  0x44   : > { %331 = vmatpush.msra.mxu0 %v309_v7  ;;  %631 = vmatpush.msra.mxu1 %v309_v7 }
  0x46   : > { %332 = vmatpush.msra.mxu0 %v308_v8  ;;  %632 = vmatpush.msra.mxu1 %v308_v8 }
  0x48   : > { %333 = vmatpush.msra.mxu0 %v307_v9  ;;  %633 = vmatpush.msra.mxu1 %v307_v9 }
  0x49   : > { %406 = vperm.xlu2 %749, %v399_v12  }
  0x4a   : > { %334 = vmatpush.msra.mxu0 %v306_v13  ;;  %634 = vmatpush.msra.mxu1 %v306_v13 }
  0x4c   : > { %335 = vmatpush.msra.mxu0 %v305_v14  ;;  %635 = vmatpush.msra.mxu1 %v305_v14 }
  0x4d   : > { %618 = vmatmul.msk.f32.vlgmr.msra.gmra.mxu0 %vm313_vm1, %v303_v15  ;;  %619 = vmatmul.msk.f32.vlgmr.msra.gmra.mxu1 %vm313_vm1, %v304_v16 }
  0x9b   : > { %v404_v17 = vpop.permute.xlu2 %403 }
  0x9c   : > { %vm408_vm2 = vcmp.eq.s32.totalorder %v349_v21, %v404_v17 }
  0xa3   : > { %v407_v22 = vpop.permute.xlu2 %406 }
  0xa4   : > { %vm409_vm4 = vcmp.eq.s32.totalorder %v349_v21, %v407_v22 }
  0xca   : > { %v337_v23 = vpop.f32.mrf.mxu0  ;;  %v340_v24 = vpop.f32.mrf.mxu1 }
  0xcb   : > { %343 = vst [vmem:[%s1085_s30] sm:$0xff] %v337_v23  ;;  %v410_v25 = vsel %vm408_vm2, %v337_v23, 0.0  ;;  %v351_v26 = vsel %vm350_vm3, %v337_v23, -inf  ;;  %v411_v27 = vsel %vm409_vm4, %v340_v24, 0.0  ;;  %v352_v28 = vsel %vm350_vm3, %v340_v24, -inf }
  0xcc   : > { %412 = vadd.xlane.f32.xlu2 %v410_v25  ;;  %355 = vmax.xlane.f32.xlu0 %v351_v26  ;;  %344 = vst [vmem:[%s1085_s30 + $0x8] sm:$0xff] %v340_v24 }
  0xd4   : > { %357 = vmax.xlane.f32.xlu0 %v352_v28 }
 0x13f   : > { %v413_v31 = vpop.xlane.xlu2 %412  ;;  %v356_v32 = vpop.xlane.xlu0 %355 }
 0x140   : > { %v416_v33 = vadd.f32 %v413_v31, %v400_v29  ;;  %v359_v34 = vmax.f32 %v353_v30, %v356_v32 }
 0x142   : > { %418 = vst.msk [vmem:[#allocation4] sm:$0xff] %vm393_vm5, %v416_v33  ;;  %v361_v35 = vsub.f32 %v353_v30, %v359_v34  ;;  %369 = vperm.xlu1 %748, %v359_v34  }
 0x143   : > { %396 = vst.msk [vmem:[#allocation2] sm:$0xff] %vm393_vm5, %v359_v34 }
 0x144   : > { %v363_v48 = vmul.f32 1.442695, %v361_v35 }
 0x147   : > { %v358_v37 = vpop.xlane.xlu0 %357 }
 0x148   : > { %v360_v38 = vmax.f32 %v354_v36, %v358_v37 }
 0x14a   : > { %v362_v39 = vsub.f32 %v354_v36, %v360_v38  ;;  %397 = vst.msk [vmem:[#allocation2 + $0x8] sm:$0xff] %vm393_vm5, %v360_v38  ;;  %374 = vperm.xlu1 %748, %v360_v38  }
 0x14c   : > { %v365_v49 = vmul.f32 1.442695, %v362_v39 }
 0x1b4   : > { %v370_v40 = vpop.permute.xlu1 %369 }
 0x1b5   : > { %v377_v41 = vsub.f32 %v351_v26, %v370_v40 }
 0x1b7   : > { %v379_v42 = vmul.f32 1.442695, %v377_v41 }
 0x1b9   : > { %751 = vpow2.f32 %v379_v42 }
 0x1bc   : > { %v375_v43 = vpop.permute.xlu1 %374 }
 0x1bd   : > { %v378_v44 = vsub.f32 %v352_v28, %v375_v43 }
 0x1bf   : > { %v752_v45 = vpop.eup %751  ;;  %v381_v46 = vmul.f32 1.442695, %v378_v44 }
 0x1c0   : > { %387 = vadd.xlane.f32.xlu0 %v752_v45 }
 0x1c1   : > { %753 = vpow2.f32 %v381_v46 }
 0x1c2   : > { %755 = vpow2.f32 %v363_v48 }
 0x1c3   : > { %757 = vpow2.f32 %v365_v49 }
 0x1c7   : > { %v754_v47 = vpop.eup %753 }
 0x1c8   : > { %414 = vadd.xlane.f32.xlu0 %v411_v27  ;;  %389 = vadd.xlane.f32.xlu1 %v754_v47  ;;  %v756_v50 = vpop.eup %755 }
 0x1c9   : > { %v385_v52 = vmul.f32 %v756_v50, %v383_v51  ;;  %v758_v55 = vpop.eup %757 }
 0x1ca   : > { %v386_v58 = vmul.f32 %v758_v55, %v384_v56 }
 0x233   : > { %v388_v53 = vpop.xlane.xlu0 %387 }
 0x234   : > { %v391_v54 = vadd.f32 %v388_v53, %v385_v52 }
 0x236   : > { %394 = vst.msk [vmem:[#allocation3] sm:$0xff] %vm393_vm5, %v391_v54 }
 0x23b   : > { %v390_v59 = vpop.xlane.xlu1 %389  ;;  %v415_v60 = vpop.xlane.xlu0 %414  ;;  %423 = sbr.rel (%p621_p9) target bundleno = 596 (0x254), region = 44 }
 0x23c   : > { %v392_v61 = vadd.f32 %v390_v59, %v386_v58  ;;  %v417_v62 = vadd.f32 %v415_v60, %v401_v57 }
 0x23e   : > { %395 = vst.msk [vmem:[#allocation3 + $0x8] sm:$0xff] %vm393_vm5, %v392_v61 }
 0x23f   : > { %419 = vst.msk [vmem:[#allocation4 + $0x8] sm:$0xff] %vm393_vm5, %v417_v62 }
 0x240   : > { %v426_v63 = vld [vmem:[#allocation3] sm:$0xff]  ;;  %v424_v2 = vld [vmem:[#allocation2] sm:$0xff]  ;;  %v425_v5 = vld [vmem:[#allocation2 + $0x8] sm:$0xff] }
 0x241   : > { %759 = vlog2.f32 %v426_v63  ;;  %v434_v6 = vld [vmem:[#allocation4] sm:$0xff] }
 0x245   : > { %v427_v0 = vld [vmem:[#allocation3 + $0x8] sm:$0xff] }
 0x246   : > { %761 = vlog2.f32 %v427_v0  ;;  %v435_v9 = vld [vmem:[#allocation4 + $0x8] sm:$0xff] }
 0x247   : > { %v760_v1 = vpop.eup %759 }
 0x248   : > { %v429_v4 = vmul.f32 0.6931472, %v760_v1 }
 0x24a   : > { %v432_v8 = vadd.f32 %v429_v4, %v424_v2 }
 0x24c   : > { %v762_v3 = vpop.eup %761  ;;  %v436_v11 = vsub.f32 %v432_v8, %v434_v6 }
 0x24d   : > { %v431_v7 = vmul.f32 0.6931472, %v762_v3 }
 0x24e   : > { %438 = vst.msk [vmem:[%s1083_s5] sm:$0xff] %vm393_vm5, %v436_v11 }
 0x24f   : > { %v433_v10 = vadd.f32 %v431_v7, %v425_v5 }
 0x251   : > { %v437_v12 = vsub.f32 %v433_v10, %v435_v9 }
 0x253   : > { %439 = vst.msk [vmem:[%s1083_s5 + $0x8] sm:$0xff] %vm393_vm5, %v437_v12 }
 0x254 PF: > { %s636_s9 = smul.u32 6, %s903_s22  ;;  %s460_s29 = sshll.u32 %s1085_s30, 4  ;;  %s461_s29 = int_to_ptr.vmem [resolvable:$true] %s460_s29 }
 0x255   : > { %s441_s8 = scalar_lea.sflag [#allocation7], %s261_s24 }
 0x256   : > { %s457_s6 = sadd.s32 %s899_s21, %s636_s9  ;;  %s813_s21 = scalar_lea.hbm %s1172_s3, 96 }
 0x257   : > { %s625_s7 = sshll.u32 %s457_s6, 3 }
 0x258   : > { %s459_s10 = scalar_lea.hbm %s1172_s3, %s625_s7 }
 0x259   : > { %s462_s11 = sshll.u32 %s459_s10, 4  ;;  %s463_s11 = int_to_ptr.hbm [resolvable:$true] %s462_s11 }
 0x25a   : > { %s807_s27 = sshra.s32 %s463_s11, 4  ;;  %s808_s27 = int_to_ptr.hbm [resolvable:$true] %s807_s27 }
 0x25b   : > { %s809_s26 = scalar_lea.hbm %s808_s27, 16  ;;  %p814_p0 = scmp.lt.s32.totalorder %s808_s27, %s1172_s3 }
 0x25c   : > { %p810_p10 = scmp.ne.s32.totalorder %s808_s27, %s809_s26  ;;  %p815_p1 = scmp.lt.s32.totalorder %s813_s21, %s809_s26 }
 0x25e   : > { %p811_p11 = pnand %p810_p10, %p1041_p13  ;;  %p816_p4 = por %p815_p1, %p814_p0 }
 0x260   : > { %p812_p12 = pneg %p811_p11 }
 0x262   : > { %p817_p5 = pnand %p816_p4, %p812_p12 }
 0x264   : > { %820 = shalt.err (!%p817_p5)
}
 0x265   : > { %s923_s24 = smov 128   ;;  %s924_s9 = smov 384  }
 0x266   : > { %s925_s6 = smov 8  }
 0x267   : > { %639 = dma.vmem_to_hbm [thread:$0]  (%p1041_p13), %s461_s29, 256, %s463_s11, %s441_s8, %s923_s24, %s924_s9, %s925_s6  }
 0x268 PF: > { %p650_p6 = scmp.ge.s32.totalorder %s915_s25, 2  ;;  %s481_s7 = sand.u32 1, %s875_s15  }
 0x269   : > { %s482_s12 = scalar_lea.sflag [#allocation7], %s481_s7 }
 0x26a   : > { %p646_p7 = pnand %p650_p6, %p1046_p2 }
 0x26c   : > { %p647_p3 = pneg %p646_p7 }
 0x26e   : > { %870 = dma.done.wait (%p647_p3), %s482_s12, 256  }
 0x26f   : > { %872 = vsyncadd (%p647_p3), %s482_s12, 4294967040  ;;  %s21_s25 = sadd.s32 1, %s915_s25   ;;  %s1186_s18 = sld [smem:[#allocation15_spill]] }
 0x270   : > { %p18_p8 = scmp.ge.s32.totalorder %s21_s25, 8   ;;  %s1187_s13 = sld [smem:[#allocation14_spill]] }
 0x271   : > { %s1188_s22 = sld [smem:[#allocation11_spill]]  ;;  %s1191_s15 = smov %s879_s16 }
 0x272   : > { %s1189_s29 = sld [smem:[#allocation12_spill]]  ;;  %s1192_s16 = smov %s883_s17 }
 0x273   : > { %s1190_s24 = sld [smem:[#allocation13_spill]]  ;;  %s1197_s21 = smov %s907_s23 }
 0x274   :  { %20 = sbr.rel (!%p18_p8) target bundleno = 9 (0x9), region = 103 }
 0x275   : > { %s1193_s17 = smov %s1186_s18  ;;  %s1194_s18 = smov %s891_s19 }
 0x276   : > { %s1195_s19 = smov %s895_s20  ;;  %s1196_s20 = smov %s1187_s13 }
 0x278   : > { %s1198_s23 = smov %s1189_s29 }
 0x279   :  { %496 = vsyncpa [#allocation6], 1 }
 0x27a   :  { %498 = vsyncpa [#allocation6 + $0x1], 1 }
 0x27b   :  { %499 = vsyncpa [#allocation7], 1 }
 0x27c   :  { %501 = vsyncpa [#allocation7 + $0x1], 1 }

</bundles_post_ra>
